<compile_context>
chip_gen: v7x
topology: tpu7x:2x2x1
jax: 0.10.0
libtpu: 0.0.40
codegen_flags: <defaults>
</compile_context>

<pallas_src>
import numpy as np
import jax
import jax.numpy as jnp
from jax.experimental import pallas as pl
from jax.experimental.pallas import tpu as pltpu


def _permute_kernel(idx_ref, x_ref, o_ref):
    # x_ref already holds the gathered source channel (all batches at once),
    # selected by the scalar-prefetched index table inside the index_map.
    o_ref[...] = x_ref[...]


def _choose_row_chunk(R, N, L, itemsize, max_block_bytes):
    """Largest chunk of the row axis that (a) divides R, (b) is a multiple of 8
    or equal to R (Mosaic sublane rule), and (c) keeps the (N,1,rc,L) block
    under the byte budget. Falls back to full R if no such divisor exists."""
    if N * R * L * itemsize <= max_block_bytes:
        return R
    for rc in range(R, 0, -1):
        if R % rc:
            continue
        if rc != R and rc % 8 != 0:
            continue
        if N * rc * L * itemsize <= max_block_bytes:
            return rc
    return R


def permute2d_pallas(x, indices, *, max_block_bytes=8 * 1024 * 1024):
    """Gather channels of NCHW `x` according to the integer vector `indices`."""
    N, C, H, W = x.shape
    indices = jnp.asarray(indices, dtype=jnp.int32)
    itemsize = jnp.dtype(x.dtype).itemsize
    HW = H * W

    # Lane-dense spatial layout: last dim a multiple of 128 whenever possible.
    if HW % 128 == 0:
        R, L = HW // 128, 128
    else:
        R, L = H, W  # fall back: block covers full (H, W) extents.

    x_r = x.reshape(N, C, R, L)  # free layout plumbing (spatial is contiguous)

    rc = _choose_row_chunk(R, N, L, itemsize, max_block_bytes)
    n_r = R // rc
    block = (N, 1, rc, L)
    block_bytes = N * rc * L * itemsize

    grid_spec = pltpu.PrefetchScalarGridSpec(
        num_scalar_prefetch=1,
        grid=(C, n_r),
        in_specs=[
            # Source: (all batches, channel indices[c], row-chunk r).
            pl.BlockSpec(block, lambda c, r, idx: (0, idx[c], r, 0)),
        ],
        out_specs=pl.BlockSpec(block, lambda c, r, idx: (0, c, r, 0)),
    )

    # in + out, double-buffered, plus headroom; never below the common default.
    vmem_bytes = min(100 * 1024 * 1024,
                     max(32 * 1024 * 1024, 4 * block_bytes + 2 * 1024 * 1024))

    out = pl.pallas_call(
        _permute_kernel,
        out_shape=jax.ShapeDtypeStruct((N, C, R, L), x.dtype),
        grid_spec=grid_spec,
        compiler_params=pltpu.CompilerParams(
            dimension_semantics=("parallel", "parallel"),
            vmem_limit_bytes=vmem_bytes,
        ),
        cost_estimate=pl.CostEstimate(
            flops=0,
            transcendentals=0,
            bytes_accessed=2 * N * C * HW * itemsize,
        ),
    )(indices, x_r)

    return out.reshape(N, C, H, W)


class Permute2dPallas:
    """JAX/Pallas port of interflow Permute2d.

    Permutation indices are built deterministically in-script;
    `shuffle=True` uses a fixed numpy seed.
    """

    def __init__(self, num_channels, shuffle, seed=0):
        self.num_channels = num_channels
        self.indices = np.arange(num_channels - 1, -1, -1).astype(np.int64)
        if shuffle:
            rng = np.random.RandomState(seed)
            rng.shuffle(self.indices)
        self.indices_inverse = np.zeros(num_channels, dtype=np.int64)
        for i in range(num_channels):
            self.indices_inverse[self.indices[i]] = i

    def __call__(self, x, reverse=False):
        assert x.ndim == 4
        idx = self.indices_inverse if reverse else self.indices
        return permute2d_pallas(x, idx)


if __name__ == "__main__":
    # Small NCHW input consistent with the module's 4-D assertion.
    N, C, H, W = 2, 4, 16, 16
    key = jax.random.PRNGKey(0)
    x = jax.random.normal(key, (N, C, H, W), dtype=jnp.float32)

    mod = Permute2dPallas(num_channels=C, shuffle=True, seed=0)

    y_fwd = jax.block_until_ready(mod(x, reverse=False))
    y_rev = jax.block_until_ready(mod(y_fwd, reverse=True))

    # Reference semantics: input[:, indices, :, :] and the inverse round-trip.
    ref_fwd = x[:, jnp.asarray(mod.indices), :, :]
    assert jnp.array_equal(y_fwd, ref_fwd), "forward permutation mismatch"
    assert jnp.array_equal(y_rev, x), "inverse permutation round-trip mismatch"
    assert y_fwd.shape == x.shape and y_fwd.dtype == x.dtype

    print("KERNEL_OK")
</pallas_src>

<mosaic_0001>
module attributes {stable_mosaic.version = 11 : i64} {
  func.func @_permute_kernel(%arg0: i32, %arg1: i32, %arg2: memref<4xi32, #tpu.memory_space<smem>>, %arg3: memref<2x1x2x128xf32, #tpu.memory_space<vmem>>, %arg4: memref<2x1x2x128xf32, #tpu.memory_space<vmem>>) attributes {dimension_semantics = [#tpu.dimension_semantics<parallel>, #tpu.dimension_semantics<parallel>], iteration_bounds = array<i64: 4, 1>, scalar_prefetch = 1 : i64, scratch_operands = 0 : i64, tpu.core_type = #tpu.core_type<tc>, window_params = [{transform_indices = @transform_0, window_bounds = array<i64: 2, 1, 2, 128>}, {transform_indices = @transform_1, window_bounds = array<i64: 2, 1, 2, 128>}]} {
    %c0 = arith.constant 0 : index
    %c0_0 = arith.constant 0 : index
    %c0_1 = arith.constant 0 : index
    %c0_2 = arith.constant 0 : index
    %0 = vector.load %arg3[%c0, %c0_0, %c0_1, %c0_2] : memref<2x1x2x128xf32, #tpu.memory_space<vmem>>, vector<2x1x2x128xf32>
    %c0_3 = arith.constant 0 : index
    %c0_4 = arith.constant 0 : index
    %c0_5 = arith.constant 0 : index
    %c0_6 = arith.constant 0 : index
    %1 = vector.load %arg4[%c0_3, %c0_4, %c0_5, %c0_6] : memref<2x1x2x128xf32, #tpu.memory_space<vmem>>, vector<2x1x2x128xf32>
    tpu.vector_store %arg4[%c0_3, %c0_4, %c0_5, %c0_6], %0 {strides = array<i32>} : memref<2x1x2x128xf32, #tpu.memory_space<vmem>>, vector<2x1x2x128xf32>,
    return
  }
  func.func @transform_0(%arg0: i32, %arg1: i32, %arg2: memref<4xi32, #tpu.memory_space<smem>>) -> (i32, i32, i32, i32) {
    %0 = arith.index_cast %arg0 : i32 to index
    %1 = memref.load %arg2[%0] : memref<4xi32, #tpu.memory_space<smem>>
    %c0_i32 = arith.constant 0 : i32
    %c0_i32_0 = arith.constant 0 : i32
    %c0_i32_1 = arith.constant 0 : i32
    return %c0_i32, %1, %arg1, %c0_i32_0 : i32, i32, i32, i32
  }
  func.func @transform_1(%arg0: i32, %arg1: i32, %arg2: memref<4xi32, #tpu.memory_space<smem>>) -> (i32, i32, i32, i32) {
    %c0_i32 = arith.constant 0 : i32
    %c0_i32_0 = arith.constant 0 : i32
    %c0_i32_1 = arith.constant 0 : i32
    return %c0_i32, %arg0, %arg1, %c0_i32_0 : i32, i32, i32, i32
  }
}

</mosaic_0001>

<bundles_post_ra>
// kernel: tpu_custom_call.1
= control target key start
LH: loop header
LB: loop body
LE: loop exit
PB: predicated region body
PF: predicated region fallthrough
CT: control target
= control target key end

     0   :  { %s766_s0 = inlined_call_operand.hbm [shape: s32[4], index: 0, kind: input, shape index: {}]   ;;  %s767_s1 = inlined_call_operand.hbm [shape: f32[2,4,2,128], index: 1, kind: input, shape index: {}]   ;;  %s768_s2 = inlined_call_operand.hbm [shape: f32[2,4,2,128], index: 2, kind: output, shape index: {}]  }
   0x1   :  { %s371_s11 = scalar_lea.hbm %s766_s0, 16 }
   0x2   :  { %p372_p0 = scmp.ne.s32.totalorder %s766_s0, %s371_s11  ;;  %p375_p1 = scmp.lt.u32.totalorder %s371_s11, %s766_s0 }
   0x4   :  { %p377_p2 = pnand %p375_p1, %p372_p0 }
   0x6   :  { %380 = shalt.err (!%p377_p2)  }
   0x7   :  { %s521_s16 = smov [#allocation3]  }
   0x8   :  { %8 = dma.hbm_to_smem %s766_s0, 16, %s521_s16, [#allocation2] }
   0x9   :  { %475 = dma.done.wait [#allocation2], 16 }
   0xa   :  { %476 = vsyncadd [#allocation2], 4294967280 }
   0xb   :  { %10 = sfence }
   0xc   :  { %11 = vsyncpa [#allocation5], 0 }
   0xd   :  { %13 = vsyncpa [#allocation5 + $0x1], 0 }
   0xe   :  { %14 = vsyncpa [#allocation6], 0 }
   0xf   :  { %16 = vsyncpa [#allocation6 + $0x1], 0  ;;  %s557_s19 = smov 0   ;;  %s559_s20 = smov 0  }
  0x10   :  { %s561_s21 = smov 0   ;;  %s563_s22 = smov 0  }
  0x11   :  { %s565_s23 = smov 0   ;;  %s567_s24 = smov 0  }
  0x12   :  { %s569_s0 = smov 0   ;;  %s571_s25 = smov 0  }
  0x13   :  { %s573_s26 = smov 0  }
  0x14 LB: > { %s261_s27 = sadd.s32 4294967295, %s519_s26   ;;  %s262_s28 = sadd.s32 4294967294, %s519_s26   ;;  %s519_s26 = sphi %s573_s26, %s22_s26   ;;  %s515_s25 = sphi %s571_s25, %s787_s25   ;;  %s511_s0 = sphi %s569_s0, %s786_s0   ;;  %s507_s24 = sphi %s567_s24, %s785_s24   ;;  %s503_s23 = sphi %s565_s23, %s784_s23   ;;  %s499_s22 = sphi %s563_s22, %s783_s22   ;;  %s495_s21 = sphi %s561_s21, %s782_s21   ;;  %s491_s20 = sphi %s559_s20, %s781_s20   ;;  %s487_s19 = sphi %s557_s19, %s780_s19  }
  0x15   : > { %s34_s29 = sadd.s32 1, %s515_s25  ;;  %s38_s30 = sld [smem:[#allocation3 + %s515_s25]] }
  0x16   : > { %p36_p3 = scmp.ge.s32.totalorder %s34_s29, 4  ;;  %s45_s3 = sadd.s32 1, %s507_s24 }
  0x17   : > { %p52_p4 = scmp.ne.s32.totalorder %s507_s24, %s503_s23  ;;  %p53_p5 = scmp.eq.s32.totalorder %s519_s26, 0 }
  0x18   : > { %s789_s29 = smov (%p36_p3, %s34_s29), 0  ;;  %p58_p7 = scmp.ne.s32.totalorder %s503_s23, %s499_s22 }
  0x19   : > { %p610_p6 = por %p53_p5, %p52_p4  ;;  %s39_s5 = sld [smem:[#allocation3 + %s789_s29]] }
  0x1a   : > { %p59_p8 = scmp.eq.s32.totalorder %s261_s27, 0  ;;  %s68_s6 = ssub.s32 %s515_s25, %s789_s29 }
  0x1b   : > { %s73_s7 = sadd.s32 1, %s495_s21  ;;  %p71_p10 = scmp.eq.s32.totalorder %s68_s6, 0 }
  0x1c   : > { %p619_p9 = por %p59_p8, %p58_p7  ;;  %p83_p11 = scmp.ne.s32.totalorder %s495_s21, %s491_s20 }
  0x1d   : > { %p84_p12 = scmp.eq.s32.totalorder %s261_s27, 3  ;;  %p89_p0 = scmp.ne.s32.totalorder %s491_s20, %s487_s19 }
  0x1e   : > { %s772_s8 = scalar_select %p619_p9, 1, 0 }
  0x1f   : > { %s626_s9 = scalar_select %p71_p10, %s495_s21, %s73_s7  }
  0x20   : > { %p628_p13 = por %p84_p12, %p83_p11  ;;  %s40_s11 = ssub.s32 %s38_s30, %s39_s5 }
  0x21   : > { %p90_p1 = scmp.eq.s32.totalorder %s262_s28, 3  ;;  %p43_p2 = scmp.eq.s32.totalorder %s40_s11, 0 }
  0x22   : > { %s773_s10 = scalar_select %p628_p13, 1, 0 }
  0x23   : > { %p634_p3 = por %p90_p1, %p89_p0  ;;  %p290_p4 = scmp.lt.s32.totalorder %s519_s26, 4 }
  0x24   : > { %s640_s13 = scalar_select %p43_p2, %s507_s24, %s45_s3  }
  0x25   : > { %s774_s12 = scalar_select %p634_p3, 1, 0 }
  0x26   : > { %s110_s14 = sand.u32 1, %s507_s24   ;;  %p645_p5 = pnand %p290_p4, %p610_p6 }
  0x27   : > { %s265_s16 = sshll.u32 %s110_s14, 2  ;;  %p267_p7 = scmp.ge.s32.totalorder %s519_s26, 1 }
  0x28   : > { %s274_s17 = scalar_select %p610_p6, [#allocation3], [#allocation8] }
  0x29   : > { %s275_s18 = scalar_select %p610_p6, %s515_s25, 0 }
  0x2a   : > { %s791_s17 = smov (!%p290_p4, %s274_s17), [#allocation9]  ;;  %s114_s27 = scalar_lea.vmem [#allocation4], %s265_s16 }
  0x2b   : > { %s793_s18 = smov (!%p290_p4, %s275_s18), 0  ;;  %s122_s28 = sshll.u32 %s114_s27, 4  ;;  %s656_s28 = int_to_ptr.vmem [resolvable:$true] %s122_s28 }
  0x2c   : > { %s115_s22 = sld [smem:[%s791_s17 + %s793_s18]]  ;;  %p130_p8 = scmp.lt.s32.totalorder %s519_s26, 5 }
  0x2d   : > { %s667_s7 = scalar_lea.sflag [#allocation5], %s110_s14  ;;  %p383_p11 = pneg %p645_p5 }
  0x2e   : > { %p658_p10 = pnand %p267_p7, %p130_p8  ;;  %s386_s18 = scalar_lea.hbm %s767_s1, 256 }
  0x32   : > { %s266_s3 = sshll.u32 %s115_s22, 5 }
  0x33   : > { %s665_s4 = scalar_lea.hbm %s767_s1, %s266_s3 }
  0x34   : > { %s381_s11 = scalar_lea.hbm %s665_s4, 64  ;;  %p387_p1 = scmp.lt.u32.totalorder %s665_s4, %s767_s1 }
  0x35   : > { %p382_p6 = scmp.ne.s32.totalorder %s665_s4, %s381_s11  ;;  %p388_p2 = scmp.lt.u32.totalorder %s386_s18, %s381_s11 }
  0x36   : > { %p390_p7 = scmp.lt.u32.totalorder %s381_s11, %s665_s4 }
  0x37   : > { %p384_p12 = pnand %p383_p11, %p382_p6  ;;  %p389_p4 = por %p388_p2, %p387_p1 }
  0x39   : > { %p385_p0 = pneg %p384_p12  ;;  %p391_p8 = por %p390_p7, %p389_p4 }
  0x3b   : > { %p392_p3 = pnand %p391_p8, %p385_p0 }
  0x3d   : > { %395 = shalt.err (!%p392_p3)
}
  0x3e   : > { %s396_s14 = scalar_lea.vmem %s656_s28, 64  ;;  %s522_s3 = smov [#allocation4]  }
  0x3f   : > { %p397_p6 = scmp.ne.s32.totalorder %s656_s28, %s396_s14  ;;  %s401_s5 = sshll.u32 %s522_s3, 4  ;;  %s402_s5 = int_to_ptr.vmem [resolvable:$false] %s401_s5 }
  0x40   : > { %s403_s6 = scalar_lea.vmem %s402_s5, 128  ;;  %p404_p9 = scmp.lt.s32.totalorder %s656_s28, %s402_s5 }
  0x41   : > { %p399_p12 = pnand %p397_p6, %p383_p11  ;;  %p405_p1 = scmp.lt.s32.totalorder %s403_s6, %s396_s14 }
  0x43   : > { %p400_p13 = pneg %p399_p12  ;;  %p406_p2 = por %p405_p1, %p404_p9 }
  0x45   : > { %p407_p4 = pnand %p406_p2, %p400_p13 }
  0x47   : > { %410 = shalt.err (!%p407_p4)
}
  0x48   : > { %s523_s11 = smov 128   ;;  %s524_s16 = smov 32  }
  0x49   : > { %s525_s17 = smov 2   ;;  %134 = sbr.rel (%p658_p10) target bundleno = 109 (0x6d), region = 24 }
  0x4a   : > { %285 = dma.hbm_to_vmem [thread:$0]  (!%p645_p5), %s665_s4, 64, %s656_s28, %s667_s7, %s523_s11, %s524_s16, %s525_s17  }
  0x4b   : > { %s136_s18 = sand.u32 (!%p658_p10), 1, %s503_s23   ;;  %p777_p9 = scmp.ne.s32.totalorder (!%p658_p10), %s772_s8, 0 }
  0x4c   : > { %s268_s22 = sshll.u32 (!%p658_p10), %s136_s18, 2  ;;  %s137_s27 = scalar_lea.sflag (!%p658_p10), [#allocation5], %s136_s18 }
  0x4d   : > { %s140_s14 = scalar_lea.vmem (!%p658_p10), [#allocation4], %s268_s22 }
  0x50   : > { %478 = dma.done.wait (%p777_p9), %s137_s27, 64  }
  0x51   : > { %480 = vsyncadd (%p777_p9), %s137_s27, 4294967232  ;;  %s156_s3 = sand.u32 1, %s491_s20   ;;  %s271_s28 = sshll.u32 %s511_s0, 5  ;;  %v160_v0 = vld [vmem:[%s140_s14] sm:$0xf]  }
  0x52   : > { %s269_s15 = sshll.u32 %s156_s3, 2  ;;  %s707_s6 = scalar_lea.hbm %s768_s2, %s271_s28 }
  0x53   : > { %s158_s4 = scalar_lea.vmem [#allocation7], %s269_s15  ;;  %s711_s8 = scalar_lea.sflag [#allocation6], %s156_s3 }
  0x54   : > { %s178_s30 = sshll.u32 %s158_s4, 4  ;;  %162 = vst [vmem:[%s158_s4] sm:$0xf] %v160_v0   ;;  %p778_p3 = scmp.ne.s32.totalorder %s773_s10, 0  ;;  %s709_s30 = int_to_ptr.vmem [resolvable:$true] %s178_s30 }
  0x55   : > { %s411_s11 = scalar_lea.vmem %s709_s30, 64  ;;  %s526_s0 = smov [#allocation7]  }
  0x56   : > { %p412_p13 = scmp.ne.s32.totalorder %s709_s30, %s411_s11  ;;  %s415_s16 = sshll.u32 %s526_s0, 4  ;;  %s416_s16 = int_to_ptr.vmem [resolvable:$false] %s415_s16 }
  0x57   : > { %s417_s17 = scalar_lea.vmem %s416_s16, 128  ;;  %p418_p11 = scmp.lt.s32.totalorder %s709_s30, %s416_s16 }
  0x58   : > { %p413_p5 = pnand %p412_p13, %p778_p3  ;;  %p419_p0 = scmp.lt.s32.totalorder %s417_s17, %s411_s11 }
  0x5a   : > { %p414_p10 = pneg %p413_p5  ;;  %p420_p7 = por %p419_p0, %p418_p11 }
  0x5c   : > { %p421_p8 = pnand %p420_p7, %p414_p10 }
  0x5e   : > { %424 = shalt.err (!%p421_p8)
}
  0x5f   : > { %s425_s18 = scalar_lea.hbm %s707_s6, 64  ;;  %s429_s14 = scalar_lea.hbm %s768_s2, 256 }
  0x60   : > { %p426_p6 = scmp.ne.s32.totalorder %s707_s6, %s425_s18  ;;  %p430_p2 = scmp.lt.u32.totalorder %s707_s6, %s768_s2 }
  0x61   : > { %p431_p4 = scmp.lt.u32.totalorder %s429_s14, %s425_s18  ;;  %p433_p13 = scmp.lt.u32.totalorder %s425_s18, %s707_s6 }
  0x62   : > { %p427_p12 = pnand %p426_p6, %p778_p3 }
  0x63   : > { %p432_p9 = por %p431_p4, %p430_p2 }
  0x64   : > { %p428_p1 = pneg %p427_p12 }
  0x65   : > { %p434_p5 = por %p433_p13, %p432_p9 }
  0x67   : > { %p435_p10 = pnand %p434_p5, %p428_p1 }
  0x69   : > { %438 = shalt.err (!%p435_p10)
}
  0x6a   : > { %s527_s28 = smov 32   ;;  %s528_s4 = smov 128  }
  0x6b   : > { %s529_s7 = smov 2  }
  0x6c   : > { %278 = dma.vmem_to_hbm [thread:$0]  (%p778_p3), %s709_s30, 64, %s707_s6, %s711_s8, %s527_s28, %s528_s4, %s529_s7  }
  0x6d PF: > { %p291_p11 = scmp.ge.s32.totalorder %s519_s26, 2  ;;  %s193_s5 = sand.u32 1, %s487_s19  }
  0x6e   : > { %p779_p0 = scmp.ne.s32.totalorder %s774_s12, 0  ;;  %s194_s11 = scalar_lea.sflag [#allocation6], %s193_s5 }
  0x70   : > { %p287_p7 = pnand %p291_p11, %p779_p0 }
  0x72   : > { %482 = dma.done.wait (!%p287_p7), %s194_s11, 64  }
  0x73   : > { %484 = vsyncadd (!%p287_p7), %s194_s11, 4294967232  ;;  %s22_s26 = sadd.s32 1, %s519_s26   ;;  %s780_s19 = smov %s491_s20 }
  0x74   : > { %p19_p8 = scmp.ge.s32.totalorder %s22_s26, 6   ;;  %s781_s20 = smov %s495_s21 }
  0x75   : > { %s782_s21 = smov %s626_s9  ;;  %s783_s22 = smov %s503_s23 }
  0x76   : > { %s784_s23 = smov %s507_s24  ;;  %s785_s24 = smov %s640_s13 }
  0x77   : > { %s786_s0 = smov %s515_s25  ;;  %s787_s25 = smov %s789_s29 }
  0x78   :  { %21 = sbr.rel (!%p19_p8) target bundleno = 20 (0x14), region = 69 }
  0x7f   :  { %199 = vsyncpa [#allocation5], 1 }
  0x80   :  { %201 = vsyncpa [#allocation5 + $0x1], 1 }
  0x81   :  { %202 = vsyncpa [#allocation6], 1 }
  0x82   :  { %204 = vsyncpa [#allocation6 + $0x1], 1 }

</bundles_post_ra>
